<compile_context>
chip_gen: v7x
topology: tpu7x:2x2x1
jax: 0.10.0
libtpu: 0.0.40
codegen_flags: <defaults>
</compile_context>

<pallas_src>
import jax
import jax.numpy as jnp
from jax.experimental import pallas as pl
from jax.experimental.pallas import tpu as pltpu


def _add_one_kernel(x_ref, o_ref):
    # Hot path: elementwise VPU add over the whole VMEM tile.
    o_ref[...] = x_ref[...] + jnp.asarray(1, dtype=o_ref.dtype)


_LANE_CANDIDATES = (4096, 2048, 1024, 512, 256, 128)  # wide last dim -> long DMA bursts
_SUBLANE_MULT = 32             # multiple of 32 rows covers f32(8)/bf16(16)/int8-fp8(32)
_DEFAULT_BLOCK_BYTES = 4 << 20  # in+out x double-buffer = 16 MiB resident
_V7X_BLOCK_BYTES = 6 << 20      # v7x: ~3.2 TB/s HBM per TC -> bigger blocks amortise step cost
_VMEM_LIMIT_CAP = 40 << 20      # safe on every generation (v7x physical VMEM = 64 MiB per TC)

_block_bytes_cache = None


def _block_bytes() -> int:
    """Per-generation DMA block size in bytes (cached; safe fallback on failure)."""
    global _block_bytes_cache
    if _block_bytes_cache is None:
        blk = _DEFAULT_BLOCK_BYTES
        try:
            info = pltpu.get_tpu_info()
            vmem = getattr(info, "vmem_capacity_bytes", None)
            # v7x-class parts report <= 64 MiB VMEM per TensorCore but have the
            # fastest HBM, so per-step overhead hurts most there -> bigger blocks.
            if vmem is not None and vmem <= (96 << 20):
                blk = _V7X_BLOCK_BYTES
        except Exception:
            pass  # keep the conservative default on any query failure
        _block_bytes_cache = blk
    return _block_bytes_cache


def _vmem_limit_bytes(block_bytes: int) -> int:
    # in + out, double-buffered, plus headroom for compiler scratch.  Set
    # explicitly so larger blocks never hit the 16/32 MiB scoped defaults.
    return min(4 * block_bytes + (8 << 20), _VMEM_LIMIT_CAP)


def _compiler_params(block_bytes: int) -> pltpu.CompilerParams:
    # "parallel": lets v7x shard the grid axis across its 2 TensorCores (each
    # TC has its own DMA path to HBM); harmless on v5e/v6e (single TC).
    # TODO(synk): verify in the Mosaic dump that v7x really splits this axis;
    #             if not, switch that dimension to pltpu.CORE_PARALLEL.
    return pltpu.CompilerParams(
        dimension_semantics=("parallel",),
        vmem_limit_bytes=_vmem_limit_bytes(block_bytes),
    )


def _add_one_2d(x2d: jax.Array) -> jax.Array:
    """x + 1 over a contiguous (rows, lanes) slab with lanes % 128 == 0."""
    rows, lanes = x2d.shape
    itemsize = jnp.dtype(x2d.dtype).itemsize  # note: assumes >= 1-byte dtypes
    block_bytes = _block_bytes()

    # Rows per tile: ~block_bytes per block, multiple of 32 sublanes
    # (dtype-agnostic), or the full row extent when the slab is small
    # (full-extent blocks are always a legal block shape).
    tile_r = max(
        _SUBLANE_MULT,
        (block_bytes // (lanes * itemsize)) // _SUBLANE_MULT * _SUBLANE_MULT,
    )
    if tile_r >= rows:
        tile_r = rows
    grid = (pl.cdiv(rows, tile_r),)

    n_bytes = rows * lanes * itemsize
    # NOTE: input_output_aliases={0: 0} would let the output overwrite the
    # input in HBM, but it only pays off when the caller donates the buffer
    # (otherwise XLA inserts a defensive copy), so it is not enabled here.
    return pl.pallas_call(
        _add_one_kernel,
        out_shape=jax.ShapeDtypeStruct((rows, lanes), x2d.dtype),
        grid_spec=pltpu.PrefetchScalarGridSpec(
            num_scalar_prefetch=0,
            grid=grid,
            in_specs=[pl.BlockSpec((tile_r, lanes), lambda i: (i, 0))],
            out_specs=pl.BlockSpec((tile_r, lanes), lambda i: (i, 0)),
        ),
        compiler_params=_compiler_params(block_bytes),
        cost_estimate=pl.CostEstimate(
            flops=rows * lanes, transcendentals=0, bytes_accessed=2 * n_bytes),
    )(x2d)


def _add_one_1d(flat: jax.Array) -> jax.Array:
    """Ragged fallback: x + 1 over the flat array, no pad/slice HBM round-trips.

    Pallas masks the partial edge block, which is safe for an elementwise op.
    """
    (n,) = flat.shape
    itemsize = jnp.dtype(flat.dtype).itemsize
    block_bytes = _block_bytes()

    tile = max(1024, (block_bytes // itemsize) // 1024 * 1024)  # multiple of 8*128
    if tile >= n:
        tile = n  # full-extent block (always legal, even when n % 128 != 0)
    grid = (pl.cdiv(n, tile),)

    return pl.pallas_call(
        _add_one_kernel,
        out_shape=jax.ShapeDtypeStruct((n,), flat.dtype),
        grid_spec=pltpu.PrefetchScalarGridSpec(
            num_scalar_prefetch=0,
            grid=grid,
            in_specs=[pl.BlockSpec((tile,), lambda i: (i,))],
            out_specs=pl.BlockSpec((tile,), lambda i: (i,)),
        ),
        compiler_params=_compiler_params(block_bytes),
        cost_estimate=pl.CostEstimate(
            flops=n, transcendentals=0, bytes_accessed=2 * n * itemsize),
    )(flat)


def add_one(x: jax.Array) -> jax.Array:
    """Forward of module M: x + 1, computed by a Pallas TPU kernel."""
    orig_shape = x.shape
    n = x.size
    if n == 0:
        return x

    # Fast path: pick the widest lane extent that exactly divides the flat
    # size, so the 2-D slab is a *free* reshape of the contiguous array
    # (no jnp.pad / slice HBM copies).
    lanes = next((c for c in _LANE_CANDIDATES if n % c == 0), None)
    if lanes is not None:
        out2d = _add_one_2d(x.reshape(n // lanes, lanes))
        return out2d.reshape(orig_shape)

    # Ragged fallback (rare sizes): tile the flat 1-D array directly; Pallas
    # masks the partial edge block, so no pad/slice (~4N extra bytes) needed.
    out = _add_one_1d(x.reshape(-1))
    return out.reshape(orig_shape)


if __name__ == "__main__":
    key = jax.random.PRNGKey(0)
    key_a, key_b = jax.random.split(key)

    # NCHW-shaped example input, consistent with a typical conv-style module.
    x = jax.random.normal(key_a, (2, 4, 16, 16), dtype=jnp.float32)
    y = add_one(x)
    jax.block_until_ready(y)
    assert y.shape == x.shape and y.dtype == x.dtype
    assert jnp.allclose(y, x + 1.0, atol=0, rtol=0)

    # Ragged-size input exercises the 1-D fallback path (full-extent block).
    xr = jax.random.normal(key_b, (3, 5, 9), dtype=jnp.float32)
    yr = add_one(xr)
    jax.block_until_ready(yr)
    assert yr.shape == xr.shape and yr.dtype == xr.dtype
    assert jnp.allclose(yr, xr + 1.0, atol=0, rtol=0)

    print("KERNEL_OK")
</pallas_src>

<mosaic_0001>
module attributes {stable_mosaic.version = 11 : i64} {
  func.func @_add_one_kernel(%arg0: i32, %arg1: memref<1x2048xf32, #tpu.memory_space<vmem>>, %arg2: memref<1x2048xf32, #tpu.memory_space<vmem>>) attributes {dimension_semantics = [#tpu.dimension_semantics<parallel>], iteration_bounds = array<i64: 1>, scalar_prefetch = 0 : i64, scratch_operands = 0 : i64, tpu.core_type = #tpu.core_type<tc>, window_params = [{transform_indices = @transform_0, window_bounds = array<i64: 1, 2048>}, {transform_indices = @transform_1, window_bounds = array<i64: 1, 2048>}]} {
    %c0 = arith.constant 0 : index
    %c0_0 = arith.constant 0 : index
    %0 = vector.load %arg1[%c0, %c0_0] : memref<1x2048xf32, #tpu.memory_space<vmem>>, vector<1x2048xf32>
    %cst = arith.constant 1.000000e+00 : f32
    %1 = vector.broadcast %cst : f32 to vector<1x2048xf32>
    %2 = arith.addf %0, %1 : vector<1x2048xf32>
    %c0_1 = arith.constant 0 : index
    %c0_2 = arith.constant 0 : index
    %3 = vector.load %arg2[%c0_1, %c0_2] : memref<1x2048xf32, #tpu.memory_space<vmem>>, vector<1x2048xf32>
    tpu.vector_store %arg2[%c0_1, %c0_2], %2 {strides = array<i32>} : memref<1x2048xf32, #tpu.memory_space<vmem>>, vector<1x2048xf32>,
    return
  }
  func.func @transform_0(%arg0: i32) -> (i32, i32) {
    %c0_i32 = arith.constant 0 : i32
    %c0_i32_0 = arith.constant 0 : i32
    return %arg0, %c0_i32 : i32, i32
  }
  func.func @transform_1(%arg0: i32) -> (i32, i32) {
    %c0_i32 = arith.constant 0 : i32
    %c0_i32_0 = arith.constant 0 : i32
    return %arg0, %c0_i32 : i32, i32
  }
}

</mosaic_0001>

<bundles_post_ra>
// kernel: tpu_custom_call.1
= control target key start
LH: loop header
LB: loop body
LE: loop exit
PB: predicated region body
PF: predicated region fallthrough
CT: control target
= control target key end

     0   :  { %6 = vsyncpa [#allocation3], 0  ;;  %s128_s0 = inlined_call_operand.hbm [shape: f32[1,2048], index: 0, kind: input, shape index: {}]   ;;  %s129_s1 = inlined_call_operand.hbm [shape: f32[1,2048], index: 1, kind: output, shape index: {}]  }
   0x1   :  { %7 = vsyncpa [#allocation4], 0  ;;  %s92_s6 = smov [#allocation2]   ;;  %s44_s10 = scalar_lea.hbm %s128_s0, 256 }
   0x2   :  { %s14_s7 = sshll.u32 %s92_s6, 4  ;;  %p45_p0 = scmp.ne.s32.totalorder %s128_s0, %s44_s10  ;;  %s15_s7 = int_to_ptr.vmem [resolvable:$true] %s14_s7 }
   0x3   :  { %p48_p1 = scmp.lt.u32.totalorder %s44_s10, %s128_s0 }
   0x5   :  { %p50_p2 = pnand %p48_p1, %p45_p0 }
   0x7   :  { %53 = shalt.err (!%p50_p2)
}
   0x8   :  { %s54_s15 = scalar_lea.vmem %s15_s7, 256  ;;  %p59_p4 = scmp.lt.s32.totalorder %s15_s7, %s15_s7 }
   0x9   :  { %p55_p3 = scmp.ne.s32.totalorder %s15_s7, %s54_s15  ;;  %p60_p5 = scmp.lt.s32.totalorder %s54_s15, %s54_s15 }
   0xb   :  { %p61_p6 = por %p60_p5, %p59_p4 }
   0xd   :  { %p62_p7 = pnand %p61_p6, %p55_p3 }
   0xf   :  { %65 = shalt.err (!%p62_p7)
}
  0x10   :  { %17 = dma.hbm_to_vmem [thread:$0]  %s128_s0, 256, %s15_s7, [#allocation3]  }
  0x11   :  { %88 = dma.done.wait [#allocation3], 256  }
  0x12   :  { %89 = vsyncadd [#allocation3], 4294967040  ;;  %s93_s18 = smov [#allocation5]   ;;  %v21_v0 = vld [vmem:[#allocation2] sm:$0xff]  ;;  %v22_v1 = vld [vmem:[#allocation2 + $0x8] sm:$0xff] }
  0x13   :  { %s33_s19 = sshll.u32 %s93_s18, 4  ;;  %v23_v2 = vadd.f32 1.0, %v21_v0  ;;  %v24_v3 = vadd.f32 1.0, %v22_v1  ;;  %s34_s19 = int_to_ptr.vmem [resolvable:$true] %s33_s19 }
  0x14   :  { %s66_s20 = scalar_lea.vmem %s34_s19, 256  ;;  %p71_p9 = scmp.lt.s32.totalorder %s34_s19, %s34_s19 }
  0x15   :  { %25 = vst [vmem:[#allocation5] sm:$0xff] %v23_v2  ;;  %26 = vst [vmem:[#allocation5 + $0x8] sm:$0xff] %v24_v3  ;;  %p67_p8 = scmp.ne.s32.totalorder %s34_s19, %s66_s20  ;;  %p72_p10 = scmp.lt.s32.totalorder %s66_s20, %s66_s20 }
  0x17   :  { %p73_p11 = por %p72_p10, %p71_p9 }
  0x19   :  { %p74_p12 = pnand %p73_p11, %p67_p8 }
  0x1b   :  { %77 = shalt.err (!%p74_p12)
}
  0x1c   :  { %s78_s22 = scalar_lea.hbm %s129_s1, 256 }
  0x1d   :  { %p79_p13 = scmp.ne.s32.totalorder %s129_s1, %s78_s22  ;;  %p82_p0 = scmp.lt.u32.totalorder %s78_s22, %s129_s1 }
  0x1f   :  { %p84_p1 = pnand %p82_p0, %p79_p13 }
  0x21   :  { %87 = shalt.err (!%p84_p1)
}
  0x22   :  { %36 = dma.vmem_to_hbm [thread:$0]  %s34_s19, 256, %s129_s1, [#allocation4]  }
  0x23   :  { %90 = dma.done.wait [#allocation4], 256  }
  0x24   :  { %91 = vsyncadd [#allocation4], 4294967040 }
  0x25   :  { %40 = vsyncpa [#allocation3], 1 }
  0x26   :  { %41 = vsyncpa [#allocation4], 1 }

</bundles_post_ra>
